<compile_context>
chip_gen: v7x
topology: tpu7x:2x2x1
jax: 0.10.0
libtpu: 0.0.40
codegen_flags: <defaults>
</compile_context>

<pallas_src>
import functools

import jax
import jax.numpy as jnp
from jax.experimental import pallas as pl
from jax.experimental.pallas import tpu as pltpu


def gru_kernel(emb_ref, start_ref, wx_ref, bx_ref, whrz_ref, whb_ref,
               lmw_ref, lmb_ref, out_ref, *, T, B):
    """GRU recurrence + lm_head, everything resident in VMEM / vregs.

    emb_ref : (T*B, n_embd)   time-major flattened embeddings (matmul dtype)
    start_ref:(1, C)  f32     initial hidden state
    wx_ref  : (E, 3C)         [Wrx | Wzx | Wbx]      bx_ref: (1, 3C) f32  [br | bz | bb]
    whrz_ref: (C, 2C)         [Wrh | Wzh]            whb_ref: (C, C)  Wbh
    lmw_ref : (C, Vpad)       zero-padded lm_head    lmb_ref: (1, Vpad) f32
    out_ref : (B*T, Vpad) f32 batch-major logits (lane-dense)
    """
    C = start_ref.shape[1]
    mxu_dtype = wx_ref.dtype  # bf16 (perf path) or f32 (exactness path)

    # --- time-parallel input projection for all gates & timesteps: one MXU matmul ---
    xproj = (jnp.dot(emb_ref[...], wx_ref[...], preferred_element_type=jnp.float32)
             + bx_ref[...])                                   # (T*B, 3C) f32
    xr_all = xproj[:, 0 * C:1 * C]
    xz_all = xproj[:, 1 * C:2 * C]
    xb_all = xproj[:, 2 * C:3 * C]

    whrz = whrz_ref[...]                                      # (C, 2C)
    whb = whb_ref[...]                                        # (C, C)

    # --- sequential recurrence: h stays in vregs (f32), loop fully unrolled (static T) ---
    h = jnp.broadcast_to(start_ref[...], (B, C))
    hs = []
    for i in range(T):
        lo = i * B                                            # static slice offsets
        xr = xr_all[lo:lo + B, :]
        xz = xz_all[lo:lo + B, :]
        xb = xb_all[lo:lo + B, :]

        hrz = jnp.dot(h.astype(mxu_dtype), whrz,
                      preferred_element_type=jnp.float32)     # (B, 2C) f32
        r = jax.nn.sigmoid(xr + hrz[:, :C])
        z = jax.nn.sigmoid(xz + hrz[:, C:])
        hbar = jnp.tanh(xb + jnp.dot((r * h).astype(mxu_dtype), whb,
                                     preferred_element_type=jnp.float32))
        h = (1.0 - z) * h + z * hbar
        hs.append(h)

    # --- batch-major (B*T, C) hidden slab: single stack + (layout-trivial) reshape ---
    hid = jnp.stack(hs, axis=1).reshape(B * T, C)             # (B, T, C) -> (B*T, C)

    # --- time-parallel lm_head: one matmul, lane-dense padded-vocab store ---
    logits = (jnp.dot(hid.astype(mxu_dtype), lmw_ref[...],
                      preferred_element_type=jnp.float32)
              + lmb_ref[...])                                 # (B*T, Vpad)
    out_ref[...] = logits


def prepare_gru_params(params, matmul_dtype=jnp.bfloat16):
    """One-time weight re-layout + cast (hoisted off the per-call path)."""
    (wte, start, cr_w, cr_b, cbar_w, cbar_b, cz_w, cz_b, lm_w, lm_b) = params
    n_embd = wte.shape[1]
    C = start.shape[1]
    vocab = lm_w.shape[1]
    vpad = ((vocab + 127) // 128) * 128

    # Split concat-input weights into embedding / hidden parts, fuse along output dim.
    wrx, wrh = cr_w[:n_embd], cr_w[n_embd:]
    wzx, wzh = cz_w[:n_embd], cz_w[n_embd:]
    wbx, wbh = cbar_w[:n_embd], cbar_w[n_embd:]
    wx = jnp.concatenate([wrx, wzx, wbx], axis=1).astype(matmul_dtype)         # (E, 3C)
    bx = jnp.concatenate([cr_b, cz_b, cbar_b]).reshape(1, 3 * C).astype(jnp.float32)
    whrz = jnp.concatenate([wrh, wzh], axis=1).astype(matmul_dtype)            # (C, 2C)
    whb = wbh.astype(matmul_dtype)                                             # (C, C)

    # Lane-dense lm_head: zero-pad vocab to a multiple of 128 (sliced back in the wrapper).
    lmw_p = jnp.zeros((C, vpad), matmul_dtype).at[:, :vocab].set(lm_w.astype(matmul_dtype))
    lmb_p = jnp.zeros((1, vpad), jnp.float32).at[:, :vocab].set(lm_b.astype(jnp.float32))

    return dict(wte=wte, start=start.astype(jnp.float32), wx=wx, bx=bx, whrz=whrz,
                whb=whb, lmw=lmw_p, lmb=lmb_p, vocab=vocab, vpad=vpad,
                matmul_dtype=matmul_dtype)


def gru_forward(x, prep):
    """x: (B, T) int32 token ids. prep: output of prepare_gru_params.
    Returns logits (B, T, vocab) float32."""
    b, t = x.shape
    vpad, vocab = prep["vpad"], prep["vocab"]

    # Glue (tiny tensors): embedding gather + time-major flatten.
    # TODO(synk): fuse the embedding gather into the kernel via scalar prefetch + pl.Element.
    emb = prep["wte"][x]                                                       # (B, T, E)
    emb_flat = (jnp.transpose(emb, (1, 0, 2))
                .reshape(t * b, -1).astype(prep["matmul_dtype"]))              # (T*B, E)

    vmem = pl.BlockSpec(memory_space=pltpu.MemorySpace.VMEM)
    out_flat = pl.pallas_call(
        functools.partial(gru_kernel, T=t, B=b),
        out_shape=jax.ShapeDtypeStruct((b * t, vpad), jnp.float32),
        in_specs=[vmem] * 8,
        out_specs=vmem,
        compiler_params=pltpu.CompilerParams(vmem_limit_bytes=32 * 1024 * 1024),
    )(emb_flat, prep["start"], prep["wx"], prep["bx"], prep["whrz"], prep["whb"],
      prep["lmw"], prep["lmb"])

    # Batch-major already; reshape is free, slice drops the zero vocab padding.
    return out_flat.reshape(b, t, vpad)[:, :, :vocab]


def gru_forward_ref(x, params):
    """Pure-JAX f32 reference mirroring the PyTorch forward (correctness check)."""
    (wte, start, cr_w, cr_b, cbar_w, cbar_b, cz_w, cz_b, lm_w, lm_b) = params
    b, t = x.shape
    emb = wte[x]
    hprev = jnp.broadcast_to(start, (b, start.shape[1]))
    hiddens = []
    for i in range(t):
        emb_i = emb[:, i, :]
        cat = jnp.concatenate([emb_i, hprev], axis=1)
        r = jax.nn.sigmoid(cat @ cr_w + cr_b)
        cat_reset = jnp.concatenate([emb_i, r * hprev], axis=1)
        hbar = jnp.tanh(cat_reset @ cbar_w + cbar_b)
        z = jax.nn.sigmoid(cat @ cz_w + cz_b)
        h = (1 - z) * hprev + z * hbar
        hiddens.append(h)
        hprev = h
    hidden = jnp.stack(hiddens, axis=1)
    return hidden @ lm_w + lm_b


def init_params(key, vocab_size, n_embd, n_embd2, dtype=jnp.float32):
    ks = jax.random.split(key, 8)
    n_cat = n_embd + n_embd2
    wte = jax.random.normal(ks[0], (vocab_size, n_embd), dtype) * 0.1
    start = jnp.zeros((1, n_embd2), dtype)
    cr_w = jax.random.normal(ks[1], (n_cat, n_embd2), dtype) / jnp.sqrt(n_cat)
    cr_b = jnp.zeros((n_embd2,), dtype)
    cbar_w = jax.random.normal(ks[2], (n_cat, n_embd2), dtype) / jnp.sqrt(n_cat)
    cbar_b = jnp.zeros((n_embd2,), dtype)
    cz_w = jax.random.normal(ks[3], (n_cat, n_embd2), dtype) / jnp.sqrt(n_cat)
    cz_b = jnp.zeros((n_embd2,), dtype)
    lm_w = (jax.random.normal(ks[4], (n_embd2, vocab_size), dtype)
            / jnp.sqrt(n_embd2)) * 0.1          # lm_head.weight.data *= 0.1
    lm_b = jnp.zeros((vocab_size,), dtype)
    return (wte, start, cr_w, cr_b, cbar_w, cbar_b, cz_w, cz_b, lm_w, lm_b)


if __name__ == "__main__":
    # Config: block_size=8, vocab_size=27, n_embd=16, n_embd2=32
    vocab_size, n_embd, n_embd2 = 27, 16, 32
    b, t = 2, 8

    key = jax.random.PRNGKey(0)
    k_params, k_x = jax.random.split(key)
    params = init_params(k_params, vocab_size, n_embd, n_embd2)
    x = jax.random.randint(k_x, (b, t), 0, vocab_size, dtype=jnp.int32)

    logits_ref = jax.block_until_ready(gru_forward_ref(x, params))

    # 1) Exactness check: f32 matmul path vs the pure-JAX reference (tight tolerance).
    prep_f32 = prepare_gru_params(params, matmul_dtype=jnp.float32)
    logits_f32 = jax.block_until_ready(gru_forward(x, prep_f32))
    assert logits_f32.shape == (b, t, vocab_size), logits_f32.shape
    assert jnp.allclose(logits_f32, logits_ref, atol=1e-5, rtol=1e-5), "f32 path mismatch"

    # 2) Perf path (per review): bf16 MXU operands, f32 accumulation & f32 gate math.
    prep_bf16 = prepare_gru_params(params, matmul_dtype=jnp.bfloat16)
    logits_bf16 = jax.block_until_ready(gru_forward(x, prep_bf16))
    assert logits_bf16.shape == (b, t, vocab_size), logits_bf16.shape
    assert jnp.allclose(logits_bf16, logits_ref, atol=2e-2, rtol=2e-2), "bf16 path mismatch"

    print("KERNEL_OK")
</pallas_src>

<mosaic_0001>
module attributes {stable_mosaic.version = 11 : i64} {
  func.func @gru_kernel(%arg0: memref<16x16xf32, #tpu.memory_space<vmem>>, %arg1: memref<1x32xf32, #tpu.memory_space<vmem>>, %arg2: memref<16x96xf32, #tpu.memory_space<vmem>>, %arg3: memref<1x96xf32, #tpu.memory_space<vmem>>, %arg4: memref<32x64xf32, #tpu.memory_space<vmem>>, %arg5: memref<32x32xf32, #tpu.memory_space<vmem>>, %arg6: memref<32x128xf32, #tpu.memory_space<vmem>>, %arg7: memref<1x128xf32, #tpu.memory_space<vmem>>, %arg8: memref<16x128xf32, #tpu.memory_space<vmem>>) attributes {dimension_semantics = [], scalar_prefetch = 0 : i64, scratch_operands = 0 : i64, tpu.core_type = #tpu.core_type<tc>} {
    %c0 = arith.constant 0 : index
    %c0_0 = arith.constant 0 : index
    %0 = vector.load %arg0[%c0, %c0_0] : memref<16x16xf32, #tpu.memory_space<vmem>>, vector<16x16xf32>
    %c0_1 = arith.constant 0 : index
    %c0_2 = arith.constant 0 : index
    %1 = vector.load %arg2[%c0_1, %c0_2] : memref<16x96xf32, #tpu.memory_space<vmem>>, vector<16x96xf32>
    %cst = arith.constant dense<0.000000e+00> : vector<16x96xf32>
    %2 = tpu.matmul %0, %1, %cst {dimension_numbers = #tpu.dot_dimension_numbers<[1], [0], [0], [1], [0, 0, 1, 1], [], []>} : vector<16x16xf32>, vector<16x96xf32>, vector<16x96xf32> -> vector<16x96xf32>
    %c0_3 = arith.constant 0 : index
    %c0_4 = arith.constant 0 : index
    %3 = vector.load %arg3[%c0_3, %c0_4] : memref<1x96xf32, #tpu.memory_space<vmem>>, vector<1x96xf32>
    %4 = vector.broadcast %3 : vector<1x96xf32> to vector<16x96xf32>
    %5 = arith.addf %2, %4 : vector<16x96xf32>
    %6 = vector.extract_strided_slice %5 {offsets = [0, 0], sizes = [16, 32], strides = [1, 1]} : vector<16x96xf32> to vector<16x32xf32>
    %7 = vector.extract_strided_slice %5 {offsets = [0, 32], sizes = [16, 32], strides = [1, 1]} : vector<16x96xf32> to vector<16x32xf32>
    %8 = vector.extract_strided_slice %5 {offsets = [0, 64], sizes = [16, 32], strides = [1, 1]} : vector<16x96xf32> to vector<16x32xf32>
    %c0_5 = arith.constant 0 : index
    %c0_6 = arith.constant 0 : index
    %9 = vector.load %arg4[%c0_5, %c0_6] : memref<32x64xf32, #tpu.memory_space<vmem>>, vector<32x64xf32>
    %c0_7 = arith.constant 0 : index
    %c0_8 = arith.constant 0 : index
    %10 = vector.load %arg5[%c0_7, %c0_8] : memref<32x32xf32, #tpu.memory_space<vmem>>, vector<32x32xf32>
    %c0_9 = arith.constant 0 : index
    %c0_10 = arith.constant 0 : index
    %11 = vector.load %arg1[%c0_9, %c0_10] : memref<1x32xf32, #tpu.memory_space<vmem>>, vector<1x32xf32>
    %12 = vector.shape_cast %11 : vector<1x32xf32> to vector<1x32xf32>
    %13 = vector.broadcast %12 : vector<1x32xf32> to vector<2x32xf32>
    %14 = vector.extract_strided_slice %6 {offsets = [0, 0], sizes = [2, 32], strides = [1, 1]} : vector<16x32xf32> to vector<2x32xf32>
    %15 = vector.extract_strided_slice %7 {offsets = [0, 0], sizes = [2, 32], strides = [1, 1]} : vector<16x32xf32> to vector<2x32xf32>
    %16 = vector.extract_strided_slice %8 {offsets = [0, 0], sizes = [2, 32], strides = [1, 1]} : vector<16x32xf32> to vector<2x32xf32>
    %cst_11 = arith.constant dense<0.000000e+00> : vector<2x64xf32>
    %17 = tpu.matmul %13, %9, %cst_11 {dimension_numbers = #tpu.dot_dimension_numbers<[1], [0], [0], [1], [0, 0, 1, 1], [], []>} : vector<2x32xf32>, vector<32x64xf32>, vector<2x64xf32> -> vector<2x64xf32>
    %18 = vector.extract_strided_slice %17 {offsets = [0, 0], sizes = [2, 32], strides = [1, 1]} : vector<2x64xf32> to vector<2x32xf32>
    %19 = arith.addf %14, %18 : vector<2x32xf32>
    %20 = arith.negf %19 : vector<2x32xf32>
    %21 = math.exp %20 : vector<2x32xf32>
    %cst_12 = arith.constant 1.000000e+00 : f32
    %22 = vector.broadcast %cst_12 : f32 to vector<2x32xf32>
    %23 = arith.addf %22, %21 : vector<2x32xf32>
    %24 = arith.divf %22, %23 : vector<2x32xf32>
    %25 = vector.extract_strided_slice %17 {offsets = [0, 32], sizes = [2, 32], strides = [1, 1]} : vector<2x64xf32> to vector<2x32xf32>
    %26 = arith.addf %15, %25 : vector<2x32xf32>
    %27 = arith.negf %26 : vector<2x32xf32>
    %28 = math.exp %27 : vector<2x32xf32>
    %cst_13 = arith.constant 1.000000e+00 : f32
    %29 = vector.broadcast %cst_13 : f32 to vector<2x32xf32>
    %30 = arith.addf %29, %28 : vector<2x32xf32>
    %31 = arith.divf %29, %30 : vector<2x32xf32>
    %32 = arith.mulf %24, %13 : vector<2x32xf32>
    %cst_14 = arith.constant dense<0.000000e+00> : vector<2x32xf32>
    %33 = tpu.matmul %32, %10, %cst_14 {dimension_numbers = #tpu.dot_dimension_numbers<[1], [0], [0], [1], [0, 0, 1, 1], [], []>} : vector<2x32xf32>, vector<32x32xf32>, vector<2x32xf32> -> vector<2x32xf32>
    %34 = arith.addf %16, %33 : vector<2x32xf32>
    %35 = math.tanh %34 : vector<2x32xf32>
    %cst_15 = arith.constant 1.000000e+00 : f32
    %36 = vector.broadcast %cst_15 : f32 to vector<2x32xf32>
    %37 = arith.subf %36, %31 : vector<2x32xf32>
    %38 = arith.mulf %37, %13 : vector<2x32xf32>
    %39 = arith.mulf %31, %35 : vector<2x32xf32>
    %40 = arith.addf %38, %39 : vector<2x32xf32>
    %41 = vector.extract_strided_slice %6 {offsets = [2, 0], sizes = [2, 32], strides = [1, 1]} : vector<16x32xf32> to vector<2x32xf32>
    %42 = vector.extract_strided_slice %7 {offsets = [2, 0], sizes = [2, 32], strides = [1, 1]} : vector<16x32xf32> to vector<2x32xf32>
    %43 = vector.extract_strided_slice %8 {offsets = [2, 0], sizes = [2, 32], strides = [1, 1]} : vector<16x32xf32> to vector<2x32xf32>
    %cst_16 = arith.constant dense<0.000000e+00> : vector<2x64xf32>
    %44 = tpu.matmul %40, %9, %cst_16 {dimension_numbers = #tpu.dot_dimension_numbers<[1], [0], [0], [1], [0, 0, 1, 1], [], []>} : vector<2x32xf32>, vector<32x64xf32>, vector<2x64xf32> -> vector<2x64xf32>
    %45 = vector.extract_strided_slice %44 {offsets = [0, 0], sizes = [2, 32], strides = [1, 1]} : vector<2x64xf32> to vector<2x32xf32>
    %46 = arith.addf %41, %45 : vector<2x32xf32>
    %47 = arith.negf %46 : vector<2x32xf32>
    %48 = math.exp %47 : vector<2x32xf32>
    %cst_17 = arith.constant 1.000000e+00 : f32
    %49 = vector.broadcast %cst_17 : f32 to vector<2x32xf32>
    %50 = arith.addf %49, %48 : vector<2x32xf32>
    %51 = arith.divf %49, %50 : vector<2x32xf32>
    %52 = vector.extract_strided_slice %44 {offsets = [0, 32], sizes = [2, 32], strides = [1, 1]} : vector<2x64xf32> to vector<2x32xf32>
    %53 = arith.addf %42, %52 : vector<2x32xf32>
    %54 = arith.negf %53 : vector<2x32xf32>
    %55 = math.exp %54 : vector<2x32xf32>
    %cst_18 = arith.constant 1.000000e+00 : f32
    %56 = vector.broadcast %cst_18 : f32 to vector<2x32xf32>
    %57 = arith.addf %56, %55 : vector<2x32xf32>
    %58 = arith.divf %56, %57 : vector<2x32xf32>
    %59 = arith.mulf %51, %40 : vector<2x32xf32>
    %cst_19 = arith.constant dense<0.000000e+00> : vector<2x32xf32>
    %60 = tpu.matmul %59, %10, %cst_19 {dimension_numbers = #tpu.dot_dimension_numbers<[1], [0], [0], [1], [0, 0, 1, 1], [], []>} : vector<2x32xf32>, vector<32x32xf32>, vector<2x32xf32> -> vector<2x32xf32>
    %61 = arith.addf %43, %60 : vector<2x32xf32>
    %62 = math.tanh %61 : vector<2x32xf32>
    %cst_20 = arith.constant 1.000000e+00 : f32
    %63 = vector.broadcast %cst_20 : f32 to vector<2x32xf32>
    %64 = arith.subf %63, %58 : vector<2x32xf32>
    %65 = arith.mulf %64, %40 : vector<2x32xf32>
    %66 = arith.mulf %58, %62 : vector<2x32xf32>
    %67 = arith.addf %65, %66 : vector<2x32xf32>
    %68 = vector.extract_strided_slice %6 {offsets = [4, 0], sizes = [2, 32], strides = [1, 1]} : vector<16x32xf32> to vector<2x32xf32>
    %69 = vector.extract_strided_slice %7 {offsets = [4, 0], sizes = [2, 32], strides = [1, 1]} : vector<16x32xf32> to vector<2x32xf32>
    %70 = vector.extract_strided_slice %8 {offsets = [4, 0], sizes = [2, 32], strides = [1, 1]} : vector<16x32xf32> to vector<2x32xf32>
    %cst_21 = arith.constant dense<0.000000e+00> : vector<2x64xf32>
    %71 = tpu.matmul %67, %9, %cst_21 {dimension_numbers = #tpu.dot_dimension_numbers<[1], [0], [0], [1], [0, 0, 1, 1], [], []>} : vector<2x32xf32>, vector<32x64xf32>, vector<2x64xf32> -> vector<2x64xf32>
    %72 = vector.extract_strided_slice %71 {offsets = [0, 0], sizes = [2, 32], strides = [1, 1]} : vector<2x64xf32> to vector<2x32xf32>
    %73 = arith.addf %68, %72 : vector<2x32xf32>
    %74 = arith.negf %73 : vector<2x32xf32>
    %75 = math.exp %74 : vector<2x32xf32>
    %cst_22 = arith.constant 1.000000e+00 : f32
    %76 = vector.broadcast %cst_22 : f32 to vector<2x32xf32>
    %77 = arith.addf %76, %75 : vector<2x32xf32>
    %78 = arith.divf %76, %77 : vector<2x32xf32>
    %79 = vector.extract_strided_slice %71 {offsets = [0, 32], sizes = [2, 32], strides = [1, 1]} : vector<2x64xf32> to vector<2x32xf32>
    %80 = arith.addf %69, %79 : vector<2x32xf32>
    %81 = arith.negf %80 : vector<2x32xf32>
    %82 = math.exp %81 : vector<2x32xf32>
    %cst_23 = arith.constant 1.000000e+00 : f32
    %83 = vector.broadcast %cst_23 : f32 to vector<2x32xf32>
    %84 = arith.addf %83, %82 : vector<2x32xf32>
    %85 = arith.divf %83, %84 : vector<2x32xf32>
    %86 = arith.mulf %78, %67 : vector<2x32xf32>
    %cst_24 = arith.constant dense<0.000000e+00> : vector<2x32xf32>
    %87 = tpu.matmul %86, %10, %cst_24 {dimension_numbers = #tpu.dot_dimension_numbers<[1], [0], [0], [1], [0, 0, 1, 1], [], []>} : vector<2x32xf32>, vector<32x32xf32>, vector<2x32xf32> -> vector<2x32xf32>
    %88 = arith.addf %70, %87 : vector<2x32xf32>
    %89 = math.tanh %88 : vector<2x32xf32>
    %cst_25 = arith.constant 1.000000e+00 : f32
    %90 = vector.broadcast %cst_25 : f32 to vector<2x32xf32>
    %91 = arith.subf %90, %85 : vector<2x32xf32>
    %92 = arith.mulf %91, %67 : vector<2x32xf32>
    %93 = arith.mulf %85, %89 : vector<2x32xf32>
    %94 = arith.addf %92, %93 : vector<2x32xf32>
    %95 = vector.extract_strided_slice %6 {offsets = [6, 0], sizes = [2, 32], strides = [1, 1]} : vector<16x32xf32> to vector<2x32xf32>
    %96 = vector.extract_strided_slice %7 {offsets = [6, 0], sizes = [2, 32], strides = [1, 1]} : vector<16x32xf32> to vector<2x32xf32>
    %97 = vector.extract_strided_slice %8 {offsets = [6, 0], sizes = [2, 32], strides = [1, 1]} : vector<16x32xf32> to vector<2x32xf32>
    %cst_26 = arith.constant dense<0.000000e+00> : vector<2x64xf32>
    %98 = tpu.matmul %94, %9, %cst_26 {dimension_numbers = #tpu.dot_dimension_numbers<[1], [0], [0], [1], [0, 0, 1, 1], [], []>} : vector<2x32xf32>, vector<32x64xf32>, vector<2x64xf32> -> vector<2x64xf32>
    %99 = vector.extract_strided_slice %98 {offsets = [0, 0], sizes = [2, 32], strides = [1, 1]} : vector<2x64xf32> to vector<2x32xf32>
    %100 = arith.addf %95, %99 : vector<2x32xf32>
    %101 = arith.negf %100 : vector<2x32xf32>
    %102 = math.exp %101 : vector<2x32xf32>
    %cst_27 = arith.constant 1.000000e+00 : f32
    %103 = vector.broadcast %cst_27 : f32 to vector<2x32xf32>
    %104 = arith.addf %103, %102 : vector<2x32xf32>
    %105 = arith.divf %103, %104 : vector<2x32xf32>
    %106 = vector.extract_strided_slice %98 {offsets = [0, 32], sizes = [2, 32], strides = [1, 1]} : vector<2x64xf32> to vector<2x32xf32>
    %107 = arith.addf %96, %106 : vector<2x32xf32>
    %108 = arith.negf %107 : vector<2x32xf32>
    %109 = math.exp %108 : vector<2x32xf32>
    %cst_28 = arith.constant 1.000000e+00 : f32
    %110 = vector.broadcast %cst_28 : f32 to vector<2x32xf32>
    %111 = arith.addf %110, %109 : vector<2x32xf32>
    %112 = arith.divf %110, %111 : vector<2x32xf32>
    %113 = arith.mulf %105, %94 : vector<2x32xf32>
    %cst_29 = arith.constant dense<0.000000e+00> : vector<2x32xf32>
    %114 = tpu.matmul %113, %10, %cst_29 {dimension_numbers = #tpu.dot_dimension_numbers<[1], [0], [0], [1], [0, 0, 1, 1], [], []>} : vector<2x32xf32>, vector<32x32xf32>, vector<2x32xf32> -> vector<2x32xf32>
    %115 = arith.addf %97, %114 : vector<2x32xf32>
    %116 = math.tanh %115 : vector<2x32xf32>
    %cst_30 = arith.constant 1.000000e+00 : f32
    %117 = vector.broadcast %cst_30 : f32 to vector<2x32xf32>
    %118 = arith.subf %117, %112 : vector<2x32xf32>
    %119 = arith.mulf %118, %94 : vector<2x32xf32>
    %120 = arith.mulf %112, %116 : vector<2x32xf32>
    %121 = arith.addf %119, %120 : vector<2x32xf32>
    %122 = vector.extract_strided_slice %6 {offsets = [8, 0], sizes = [2, 32], strides = [1, 1]} : vector<16x32xf32> to vector<2x32xf32>
    %123 = vector.extract_strided_slice %7 {offsets = [8, 0], sizes = [2, 32], strides = [1, 1]} : vector<16x32xf32> to vector<2x32xf32>
    %124 = vector.extract_strided_slice %8 {offsets = [8, 0], sizes = [2, 32], strides = [1, 1]} : vector<16x32xf32> to vector<2x32xf32>
    %cst_31 = arith.constant dense<0.000000e+00> : vector<2x64xf32>
    %125 = tpu.matmul %121, %9, %cst_31 {dimension_numbers = #tpu.dot_dimension_numbers<[1], [0], [0], [1], [0, 0, 1, 1], [], []>} : vector<2x32xf32>, vector<32x64xf32>, vector<2x64xf32> -> vector<2x64xf32>
    %126 = vector.extract_strided_slice %125 {offsets = [0, 0], sizes = [2, 32], strides = [1, 1]} : vector<2x64xf32> to vector<2x32xf32>
    %127 = arith.addf %122, %126 : vector<2x32xf32>
    %128 = arith.negf %127 : vector<2x32xf32>
    %129 = math.exp %128 : vector<2x32xf32>
    %cst_32 = arith.constant 1.000000e+00 : f32
    %130 = vector.broadcast %cst_32 : f32 to vector<2x32xf32>
    %131 = arith.addf %130, %129 : vector<2x32xf32>
    %132 = arith.divf %130, %131 : vector<2x32xf32>
    %133 = vector.extract_strided_slice %125 {offsets = [0, 32], sizes = [2, 32], strides = [1, 1]} : vector<2x64xf32> to vector<2x32xf32>
    %134 = arith.addf %123, %133 : vector<2x32xf32>
    %135 = arith.negf %134 : vector<2x32xf32>
    %136 = math.exp %135 : vector<2x32xf32>
    %cst_33 = arith.constant 1.000000e+00 : f32
    %137 = vector.broadcast %cst_33 : f32 to vector<2x32xf32>
    %138 = arith.addf %137, %136 : vector<2x32xf32>
    %139 = arith.divf %137, %138 : vector<2x32xf32>
    %140 = arith.mulf %132, %121 : vector<2x32xf32>
    %cst_34 = arith.constant dense<0.000000e+00> : vector<2x32xf32>
    %141 = tpu.matmul %140, %10, %cst_34 {dimension_numbers = #tpu.dot_dimension_numbers<[1], [0], [0], [1], [0, 0, 1, 1], [], []>} : vector<2x32xf32>, vector<32x32xf32>, vector<2x32xf32> -> vector<2x32xf32>
    %142 = arith.addf %124, %141 : vector<2x32xf32>
    %143 = math.tanh %142 : vector<2x32xf32>
    %cst_35 = arith.constant 1.000000e+00 : f32
    %144 = vector.broadcast %cst_35 : f32 to vector<2x32xf32>
    %145 = arith.subf %144, %139 : vector<2x32xf32>
    %146 = arith.mulf %145, %121 : vector<2x32xf32>
    %147 = arith.mulf %139, %143 : vector<2x32xf32>
    %148 = arith.addf %146, %147 : vector<2x32xf32>
    %149 = vector.extract_strided_slice %6 {offsets = [10, 0], sizes = [2, 32], strides = [1, 1]} : vector<16x32xf32> to vector<2x32xf32>
    %150 = vector.extract_strided_slice %7 {offsets = [10, 0], sizes = [2, 32], strides = [1, 1]} : vector<16x32xf32> to vector<2x32xf32>
    %151 = vector.extract_strided_slice %8 {offsets = [10, 0], sizes = [2, 32], strides = [1, 1]} : vector<16x32xf32> to vector<2x32xf32>
    %cst_36 = arith.constant dense<0.000000e+00> : vector<2x64xf32>
    %152 = tpu.matmul %148, %9, %cst_36 {dimension_numbers = #tpu.dot_dimension_numbers<[1], [0], [0], [1], [0, 0, 1, 1], [], []>} : vector<2x32xf32>, vector<32x64xf32>, vector<2x64xf32> -> vector<2x64xf32>
    %153 = vector.extract_strided_slice %152 {offsets = [0, 0], sizes = [2, 32], strides = [1, 1]} : vector<2x64xf32> to vector<2x32xf32>
    %154 = arith.addf %149, %153 : vector<2x32xf32>
    %155 = arith.negf %154 : vector<2x32xf32>
    %156 = math.exp %155 : vector<2x32xf32>
    %cst_37 = arith.constant 1.000000e+00 : f32
    %157 = vector.broadcast %cst_37 : f32 to vector<2x32xf32>
    %158 = arith.addf %157, %156 : vector<2x32xf32>
    %159 = arith.divf %157, %158 : vector<2x32xf32>
    %160 = vector.extract_strided_slice %152 {offsets = [0, 32], sizes = [2, 32], strides = [1, 1]} : vector<2x64xf32> to vector<2x32xf32>
    %161 = arith.addf %150, %160 : vector<2x32xf32>
    %162 = arith.negf %161 : vector<2x32xf32>
    %163 = math.exp %162 : vector<2x32xf32>
    %cst_38 = arith.constant 1.000000e+00 : f32
    %164 = vector.broadcast %cst_38 : f32 to vector<2x32xf32>
    %165 = arith.addf %164, %163 : vector<2x32xf32>
    %166 = arith.divf %164, %165 : vector<2x32xf32>
    %167 = arith.mulf %159, %148 : vector<2x32xf32>
    %cst_39 = arith.constant dense<0.000000e+00> : vector<2x32xf32>
    %168 = tpu.matmul %167, %10, %cst_39 {dimension_numbers = #tpu.dot_dimension_numbers<[1], [0], [0], [1], [0, 0, 1, 1], [], []>} : vector<2x32xf32>, vector<32x32xf32>, vector<2x32xf32> -> vector<2x32xf32>
    %169 = arith.addf %151, %168 : vector<2x32xf32>
    %170 = math.tanh %169 : vector<2x32xf32>
    %cst_40 = arith.constant 1.000000e+00 : f32
    %171 = vector.broadcast %cst_40 : f32 to vector<2x32xf32>
    %172 = arith.subf %171, %166 : vector<2x32xf32>
    %173 = arith.mulf %172, %148 : vector<2x32xf32>
    %174 = arith.mulf %166, %170 : vector<2x32xf32>
    %175 = arith.addf %173, %174 : vector<2x32xf32>
    %176 = vector.extract_strided_slice %6 {offsets = [12, 0], sizes = [2, 32], strides = [1, 1]} : vector<16x32xf32> to vector<2x32xf32>
    %177 = vector.extract_strided_slice %7 {offsets = [12, 0], sizes = [2, 32], strides = [1, 1]} : vector<16x32xf32> to vector<2x32xf32>
    %178 = vector.extract_strided_slice %8 {offsets = [12, 0], sizes = [2, 32], strides = [1, 1]} : vector<16x32xf32> to vector<2x32xf32>
    %cst_41 = arith.constant dense<0.000000e+00> : vector<2x64xf32>
    %179 = tpu.matmul %175, %9, %cst_41 {dimension_numbers = #tpu.dot_dimension_numbers<[1], [0], [0], [1], [0, 0, 1, 1], [], []>} : vector<2x32xf32>, vector<32x64xf32>, vector<2x64xf32> -> vector<2x64xf32>
    %180 = vector.extract_strided_slice %179 {offsets = [0, 0], sizes = [2, 32], strides = [1, 1]} : vector<2x64xf32> to vector<2x32xf32>
    %181 = arith.addf %176, %180 : vector<2x32xf32>
    %182 = arith.negf %181 : vector<2x32xf32>
    %183 = math.exp %182 : vector<2x32xf32>
    %cst_42 = arith.constant 1.000000e+00 : f32
    %184 = vector.broadcast %cst_42 : f32 to vector<2x32xf32>
    %185 = arith.addf %184, %183 : vector<2x32xf32>
    %186 = arith.divf %184, %185 : vector<2x32xf32>
    %187 = vector.extract_strided_slice %179 {offsets = [0, 32], sizes = [2, 32], strides = [1, 1]} : vector<2x64xf32> to vector<2x32xf32>
    %188 = arith.addf %177, %187 : vector<2x32xf32>
    %189 = arith.negf %188 : vector<2x32xf32>
    %190 = math.exp %189 : vector<2x32xf32>
    %cst_43 = arith.constant 1.000000e+00 : f32
    %191 = vector.broadcast %cst_43 : f32 to vector<2x32xf32>
    %192 = arith.addf %191, %190 : vector<2x32xf32>
    %193 = arith.divf %191, %192 : vector<2x32xf32>
    %194 = arith.mulf %186, %175 : vector<2x32xf32>
    %cst_44 = arith.constant dense<0.000000e+00> : vector<2x32xf32>
    %195 = tpu.matmul %194, %10, %cst_44 {dimension_numbers = #tpu.dot_dimension_numbers<[1], [0], [0], [1], [0, 0, 1, 1], [], []>} : vector<2x32xf32>, vector<32x32xf32>, vector<2x32xf32> -> vector<2x32xf32>
    %196 = arith.addf %178, %195 : vector<2x32xf32>
    %197 = math.tanh %196 : vector<2x32xf32>
    %cst_45 = arith.constant 1.000000e+00 : f32
    %198 = vector.broadcast %cst_45 : f32 to vector<2x32xf32>
    %199 = arith.subf %198, %193 : vector<2x32xf32>
    %200 = arith.mulf %199, %175 : vector<2x32xf32>
    %201 = arith.mulf %193, %197 : vector<2x32xf32>
    %202 = arith.addf %200, %201 : vector<2x32xf32>
    %203 = vector.extract_strided_slice %6 {offsets = [14, 0], sizes = [2, 32], strides = [1, 1]} : vector<16x32xf32> to vector<2x32xf32>
    %204 = vector.extract_strided_slice %7 {offsets = [14, 0], sizes = [2, 32], strides = [1, 1]} : vector<16x32xf32> to vector<2x32xf32>
    %205 = vector.extract_strided_slice %8 {offsets = [14, 0], sizes = [2, 32], strides = [1, 1]} : vector<16x32xf32> to vector<2x32xf32>
    %cst_46 = arith.constant dense<0.000000e+00> : vector<2x64xf32>
    %206 = tpu.matmul %202, %9, %cst_46 {dimension_numbers = #tpu.dot_dimension_numbers<[1], [0], [0], [1], [0, 0, 1, 1], [], []>} : vector<2x32xf32>, vector<32x64xf32>, vector<2x64xf32> -> vector<2x64xf32>
    %207 = vector.extract_strided_slice %206 {offsets = [0, 0], sizes = [2, 32], strides = [1, 1]} : vector<2x64xf32> to vector<2x32xf32>
    %208 = arith.addf %203, %207 : vector<2x32xf32>
    %209 = arith.negf %208 : vector<2x32xf32>
    %210 = math.exp %209 : vector<2x32xf32>
    %cst_47 = arith.constant 1.000000e+00 : f32
    %211 = vector.broadcast %cst_47 : f32 to vector<2x32xf32>
    %212 = arith.addf %211, %210 : vector<2x32xf32>
    %213 = arith.divf %211, %212 : vector<2x32xf32>
    %214 = vector.extract_strided_slice %206 {offsets = [0, 32], sizes = [2, 32], strides = [1, 1]} : vector<2x64xf32> to vector<2x32xf32>
    %215 = arith.addf %204, %214 : vector<2x32xf32>
    %216 = arith.negf %215 : vector<2x32xf32>
    %217 = math.exp %216 : vector<2x32xf32>
    %cst_48 = arith.constant 1.000000e+00 : f32
    %218 = vector.broadcast %cst_48 : f32 to vector<2x32xf32>
    %219 = arith.addf %218, %217 : vector<2x32xf32>
    %220 = arith.divf %218, %219 : vector<2x32xf32>
    %221 = arith.mulf %213, %202 : vector<2x32xf32>
    %cst_49 = arith.constant dense<0.000000e+00> : vector<2x32xf32>
    %222 = tpu.matmul %221, %10, %cst_49 {dimension_numbers = #tpu.dot_dimension_numbers<[1], [0], [0], [1], [0, 0, 1, 1], [], []>} : vector<2x32xf32>, vector<32x32xf32>, vector<2x32xf32> -> vector<2x32xf32>
    %223 = arith.addf %205, %222 : vector<2x32xf32>
    %224 = math.tanh %223 : vector<2x32xf32>
    %cst_50 = arith.constant 1.000000e+00 : f32
    %225 = vector.broadcast %cst_50 : f32 to vector<2x32xf32>
    %226 = arith.subf %225, %220 : vector<2x32xf32>
    %227 = arith.mulf %226, %202 : vector<2x32xf32>
    %228 = arith.mulf %220, %224 : vector<2x32xf32>
    %229 = arith.addf %227, %228 : vector<2x32xf32>
    %230 = vector.shape_cast %40 : vector<2x32xf32> to vector<2x1x32xf32>
    %231 = vector.shape_cast %67 : vector<2x32xf32> to vector<2x1x32xf32>
    %232 = vector.shape_cast %94 : vector<2x32xf32> to vector<2x1x32xf32>
    %233 = vector.shape_cast %121 : vector<2x32xf32> to vector<2x1x32xf32>
    %234 = vector.shape_cast %148 : vector<2x32xf32> to vector<2x1x32xf32>
    %235 = vector.shape_cast %175 : vector<2x32xf32> to vector<2x1x32xf32>
    %236 = vector.shape_cast %202 : vector<2x32xf32> to vector<2x1x32xf32>
    %237 = vector.shape_cast %229 : vector<2x32xf32> to vector<2x1x32xf32>
    %238 = tpu.concatenate %230, %231, %232, %233, %234, %235, %236, %237 in 1 : vector<2x1x32xf32>, vector<2x1x32xf32>, vector<2x1x32xf32>, vector<2x1x32xf32>, vector<2x1x32xf32>, vector<2x1x32xf32>, vector<2x1x32xf32>, vector<2x1x32xf32> -> vector<2x8x32xf32>
    %239 = vector.shape_cast %238 : vector<2x8x32xf32> to vector<16x32xf32>
    %c0_51 = arith.constant 0 : index
    %c0_52 = arith.constant 0 : index
    %240 = vector.load %arg6[%c0_51, %c0_52] : memref<32x128xf32, #tpu.memory_space<vmem>>, vector<32x128xf32>
    %cst_53 = arith.constant dense<0.000000e+00> : vector<16x128xf32>
    %241 = tpu.matmul %239, %240, %cst_53 {dimension_numbers = #tpu.dot_dimension_numbers<[1], [0], [0], [1], [0, 0, 1, 1], [], []>} : vector<16x32xf32>, vector<32x128xf32>, vector<16x128xf32> -> vector<16x128xf32>
    %c0_54 = arith.constant 0 : index
    %c0_55 = arith.constant 0 : index
    %242 = vector.load %arg7[%c0_54, %c0_55] : memref<1x128xf32, #tpu.memory_space<vmem>>, vector<1x128xf32>
    %243 = vector.broadcast %242 : vector<1x128xf32> to vector<16x128xf32>
    %244 = arith.addf %241, %243 : vector<16x128xf32>
    %c0_56 = arith.constant 0 : index
    %c0_57 = arith.constant 0 : index
    %245 = vector.load %arg8[%c0_56, %c0_57] : memref<16x128xf32, #tpu.memory_space<vmem>>, vector<16x128xf32>
    tpu.vector_store %arg8[%c0_56, %c0_57], %244 {strides = array<i32>} : memref<16x128xf32, #tpu.memory_space<vmem>>, vector<16x128xf32>,
    return
  }
}

</mosaic_0001>

<bundles_post_ra>
// kernel: tpu_custom_call.1
= control target key start
LH: loop header
LB: loop body
LE: loop exit
PB: predicated region body
PF: predicated region fallthrough
CT: control target
= control target key end

     0   :  { %13 = vsyncpa [#allocation3], 0  ;;  %s3049_s0 = inlined_call_operand.hbm [shape: f32[16,16], index: 0, kind: input, shape index: {}]   ;;  %s3050_s1 = inlined_call_operand.vmem [shape: f32[1,32], index: 1, kind: input, shape index: {}]   ;;  %s3051_s2 = inlined_call_operand.hbm [shape: f32[16,96], index: 2, kind: input, shape index: {}]   ;;  %s3052_s3 = inlined_call_operand.vmem [shape: f32[1,96], index: 3, kind: input, shape index: {}]   ;;  %s3053_s4 = inlined_call_operand.hbm [shape: f32[32,64], index: 4, kind: input, shape index: {}]   ;;  %s3054_s5 = inlined_call_operand.hbm [shape: f32[32,32], index: 5, kind: input, shape index: {}]   ;;  %s3055_s6 = inlined_call_operand.hbm [shape: f32[32,128], index: 6, kind: input, shape index: {}]   ;;  %s3056_s7 = inlined_call_operand.vmem [shape: f32[1,128], index: 7, kind: input, shape index: {}]   ;;  %s3057_s8 = inlined_call_operand.hbm [shape: f32[16,128], index: 8, kind: output, shape index: {}]  }
   0x1   :  { %14 = vsyncpa [#allocation6], 0 }
   0x2   :  { %15 = vsyncpa [#allocation9], 0 }
   0x3   :  { %16 = vsyncpa [#allocation4], 0  ;;  %s2659_s27 = smov [#allocation5]   ;;  %s2660_s29 = smov [#allocation8]  }
   0x4   :  { %s36_s28 = sshll.u32 %s2659_s27, 4  ;;  %s62_s30 = sshll.u32 %s2660_s29, 4  ;;  %s37_s28 = int_to_ptr.vmem [resolvable:$true] %s36_s28  ;;  %s2719_s30 = int_to_ptr.vmem [resolvable:$true] %s62_s30 }
   0x5   :  { %s2519_s11 = scalar_lea.hbm %s3051_s2, 256 }
   0x6   :  { %p2520_p0 = scmp.ne.s32.totalorder %s3051_s2, %s2519_s11  ;;  %p2523_p1 = scmp.lt.u32.totalorder %s2519_s11, %s3051_s2 }
   0x8   :  { %p2525_p2 = pnand %p2523_p1, %p2520_p0 }
   0xa   :  { %2528 = shalt.err (!%p2525_p2)
}
   0xb   :  { %s2529_s16 = scalar_lea.vmem %s37_s28, 256  ;;  %p2534_p4 = scmp.lt.s32.totalorder %s37_s28, %s37_s28 }
   0xc   :  { %p2530_p3 = scmp.ne.s32.totalorder %s37_s28, %s2529_s16  ;;  %p2535_p5 = scmp.lt.s32.totalorder %s2529_s16, %s2529_s16 }
   0xe   :  { %p2536_p6 = por %p2535_p5, %p2534_p4 }
  0x10   :  { %p2537_p7 = pnand %p2536_p6, %p2530_p3 }
  0x12   :  { %2540 = shalt.err (!%p2537_p7)
}
  0x13   :  { %s2661_s17 = smov 128   ;;  %s2662_s18 = smov 8  }
  0x14   :  { %42 = dma.hbm_to_vmem [thread:$0]  %s3051_s2, 256, %s37_s28, [#allocation6], %s2661_s17, %s2661_s17, %s2662_s18  }
  0x15   :  { %s2541_s23 = scalar_lea.hbm %s3054_s5, 512 }
  0x16   :  { %p2542_p8 = scmp.ne.s32.totalorder %s3054_s5, %s2541_s23  ;;  %p2545_p9 = scmp.lt.u32.totalorder %s2541_s23, %s3054_s5 }
  0x18   :  { %p2547_p10 = pnand %p2545_p9, %p2542_p8 }
  0x1a   :  { %2550 = shalt.err (!%p2547_p10)
}
  0x1b   :  { %s2551_s29 = scalar_lea.vmem %s2719_s30, 512  ;;  %p2556_p12 = scmp.lt.s32.totalorder %s2719_s30, %s2719_s30 }
  0x1c   :  { %p2552_p11 = scmp.ne.s32.totalorder %s2719_s30, %s2551_s29  ;;  %p2557_p13 = scmp.lt.s32.totalorder %s2551_s29, %s2551_s29 }
  0x1e   :  { %p2558_p0 = por %p2557_p13, %p2556_p12 }
  0x20   :  { %p2559_p1 = pnand %p2558_p0, %p2552_p11 }
  0x22   :  { %2562 = shalt.err (!%p2559_p1)
}
  0x23   :  { %68 = dma.hbm_to_vmem [thread:$0]  %s3054_s5, 512, %s2719_s30, [#allocation9], %s2661_s17, %s2661_s17, %s2662_s18  }
  0x24   :  { %s2663_s9 = smov [#allocation2]   ;;  %s2664_s11 = smov [#allocation7]  }
  0x25   :  { %s22_s10 = sshll.u32 %s2663_s9, 4  ;;  %s50_s12 = sshll.u32 %s2664_s11, 4  ;;  %s23_s10 = int_to_ptr.vmem [resolvable:$true] %s22_s10  ;;  %s2756_s12 = int_to_ptr.vmem [resolvable:$true] %s50_s12 }
  0x26   :  { %s2563_s15 = scalar_lea.hbm %s3049_s0, 256 }
  0x27   :  { %p2564_p2 = scmp.ne.s32.totalorder %s3049_s0, %s2563_s15  ;;  %p2567_p3 = scmp.lt.u32.totalorder %s2563_s15, %s3049_s0 }
  0x29   :  { %p2569_p4 = pnand %p2567_p3, %p2564_p2 }
  0x2b   :  { %2572 = shalt.err (!%p2569_p4)
}
  0x2c   :  { %s2573_s5 = scalar_lea.vmem %s23_s10, 256  ;;  %p2578_p6 = scmp.lt.s32.totalorder %s23_s10, %s23_s10 }
  0x2d   :  { %p2574_p5 = scmp.ne.s32.totalorder %s23_s10, %s2573_s5  ;;  %p2579_p7 = scmp.lt.s32.totalorder %s2573_s5, %s2573_s5 }
  0x2f   :  { %p2580_p8 = por %p2579_p7, %p2578_p6 }
  0x31   :  { %p2581_p9 = pnand %p2580_p8, %p2574_p5 }
  0x33   :  { %2584 = shalt.err (!%p2581_p9)
}
  0x34   :  { %28 = dma.hbm_to_vmem [thread:$0]  %s3049_s0, 256, %s23_s10, [#allocation3], %s2661_s17, %s2661_s17, %s2662_s18  }
  0x35   :  { %s2585_s25 = scalar_lea.hbm %s3053_s4, 512 }
  0x36   :  { %p2586_p10 = scmp.ne.s32.totalorder %s3053_s4, %s2585_s25  ;;  %p2589_p11 = scmp.lt.u32.totalorder %s2585_s25, %s3053_s4 }
  0x38   :  { %p2591_p12 = pnand %p2589_p11, %p2586_p10 }
  0x3a   :  { %2594 = shalt.err (!%p2591_p12)
}
  0x3b   :  { %s2595_s28 = scalar_lea.vmem %s2756_s12, 512  ;;  %p2600_p0 = scmp.lt.s32.totalorder %s2756_s12, %s2756_s12 }
  0x3c   :  { %p2596_p13 = scmp.ne.s32.totalorder %s2756_s12, %s2595_s28  ;;  %p2601_p1 = scmp.lt.s32.totalorder %s2595_s28, %s2595_s28 }
  0x3e   :  { %p2602_p2 = por %p2601_p1, %p2600_p0 }
  0x40   :  { %p2603_p3 = pnand %p2602_p2, %p2596_p13 }
  0x42   :  { %2606 = shalt.err (!%p2603_p3)
}
  0x43   :  { %56 = dma.hbm_to_vmem [thread:$0]  %s3053_s4, 512, %s2756_s12, [#allocation6], %s2661_s17, %s2661_s17, %s2662_s18  }
  0x44   :  { %s2665_s10 = smov [#allocation10]   ;;  %s2607_s15 = scalar_lea.hbm %s3055_s6, 512 }
  0x45   :  { %s74_s11 = sshll.u32 %s2665_s10, 4  ;;  %p2608_p4 = scmp.ne.s32.totalorder %s3055_s6, %s2607_s15  ;;  %s75_s11 = int_to_ptr.vmem [resolvable:$true] %s74_s11 }
  0x46   :  { %p2611_p5 = scmp.lt.u32.totalorder %s2607_s15, %s3055_s6 }
  0x48   :  { %p2613_p6 = pnand %p2611_p5, %p2608_p4 }
  0x4a   :  { %2616 = shalt.err (!%p2613_p6)
}
  0x4b   :  { %s2617_s5 = scalar_lea.vmem %s75_s11, 512  ;;  %p2622_p8 = scmp.lt.s32.totalorder %s75_s11, %s75_s11 }
  0x4c   :  { %p2618_p7 = scmp.ne.s32.totalorder %s75_s11, %s2617_s5  ;;  %p2623_p9 = scmp.lt.s32.totalorder %s2617_s5, %s2617_s5 }
  0x4e   :  { %p2624_p10 = por %p2623_p9, %p2622_p8 }
  0x50   :  { %p2625_p11 = pnand %p2624_p10, %p2618_p7 }
  0x52   :  { %2628 = shalt.err (!%p2625_p11)
}
  0x53   :  { %80 = dma.hbm_to_vmem [thread:$0]  %s3055_s6, 512, %s75_s11, [#allocation9], %s2661_s17, %s2661_s17, %s2662_s18  }
  0x54   :  { %2651 = dma.done.wait [#allocation3], 256  }
  0x55   :  { %2652 = vsyncadd [#allocation3], 4294967040 }
  0x56   :  { %2653 = dma.done.wait [#allocation6], 768  }
  0x57   :  { %2654 = vsyncadd [#allocation6], 4294966528 }
  0x58   :  { %2655 = dma.done.wait [#allocation9], 1024  }
  0x59   :  { %2656 = vsyncadd [#allocation9], 4294966272  ;;  %v2666_v0 = vmov 0.0|0.0   ;;  %vm2667_vm0 = vmmov 0   ;;  %v2668_v1 = vmov 0.0   ;;  %vm109_vm1 = vcmask 130048  }
  0x5a   :  { %2352 = vmatprep.subr.bf16.mxu1 %v2666_v0  ;;  %2169 = vmatprep.mubr.msk.f32.mxu1 %vm2667_vm0, %v2668_v1  ;;  %v100_v2 = vld [vmem:[#allocation5] sm:$0xff]  ;;  %v101_v3 = vld [vmem:[#allocation5 + $0x8] sm:$0xff]  ;;  %v191_v4 = vld [vmem:[#allocation7] sm:$0xff]  ;;  %vm206_vm2 = vcmask 261120   ;;  %s2670_s23 = smov 32   ;;  %s2671_s24 = smov 96  }
  0x5b   :  { %v2348_v5 = vpack.c.bf16 %v101_v3, %v100_v2  ;;  %v192_v6 = vld [vmem:[#allocation7 + $0x8] sm:$0xff]  ;;  %v98_v7 = vld [vmem:[#allocation2] sm:$0xff]  ;;  %v193_v9 = vld [vmem:[#allocation7 + $0x10] sm:$0xff]  ;;  %v2672_v63 = vmov 1966171168   ;;  %v1637_v3 = vlaneseq  ;;  %vm1895_vm3 = vcmask 1040384  }
  0x5c   :  { %v2811_v8 = vpack.c.bf16 %v192_v6, %v191_v4  ;;  %2158 = vmatprep.mubr.msk.f32.mxu0 %vm109_vm1, %v98_v7  ;;  %v194_v10 = vld [vmem:[#allocation7 + $0x18] sm:$0xff]  ;;  %v99_v11 = vld [vmem:[#allocation2 + $0x8] sm:$0xff]  ;;  %v2036_v13 = vld [vmem:[%s3050_s1] ss:$0 sm:$0xff]  ;;  %v1635_v2 = vunpack.c.l.s4 %v2672_v63  ;;  %vm1898_vm4 = vcmask 1041408   ;;  %vm1901_vm5 = vcmask 1042432  }
  0x5d   :  { %2349 = vmatprep.subr.bf16.mxu0 %v2348_v5  ;;  %v2815_v12 = vpack.c.bf16 %v194_v10, %v193_v9  ;;  %v195_v14 = vld [vmem:[#allocation8] sm:$0xff]  ;;  %v196_v15 = vld [vmem:[#allocation8 + $0x8] sm:$0xff]  ;;  %v197_v16 = vld [vmem:[#allocation8 + $0x10] sm:$0xff]  ;;  %vm1904_vm6 = vcmask 1043456   ;;  %vm1907_vm7 = vcmask 1044480   ;;  %vm1910_vm8 = vcmask 1045504  }
  0x5e   :  { %2354 = vmatpush3.bf16.msra.mxu1 %v2811_v8  ;;  %2351 = vmatpush3.bf16.msra.mxu0 %v2348_v5  ;;  %v2834_v17 = vpack.c.bf16 %v196_v15, %v195_v14  ;;  %v198_v18 = vld [vmem:[#allocation8 + $0x18] sm:$0xff]  ;;  %v2033_v20 = vld [vmem:[%s3052_s3] ss:$0 sm:$0xff]  ;;  %s2669_s3 = smov 64   ;;  %v1636_v4 = vunpack.c.0.s8 %v1635_v2  ;;  %v1638_v5 = vshrl.u32 %v1637_v3, 7  ;;  %vm1913_vm9 = vcmask 1046528  }
  0x5f   :  { %2355 = vmatprep.subr.bf16.mxu1 %v2666_v0  ;;  %2358 = vmatprep.subr.bf16.mxu0 %v2666_v0  ;;  %v2837_v19 = vpack.c.bf16 %v198_v18, %v197_v16  ;;  %s2673_s27 = smov [#allocation11]  }
  0x60   :  { %v2880_v9 = vsub.s32 %v1636_v4, %v1638_v5  ;;  %s2019_s29 = sshll.u32 %s2673_s27, 4  ;;  %s2020_s29 = int_to_ptr.vmem [resolvable:$true] %s2019_s29 }
  0x61   :  { %2159 = vmatmul.mubr.msk.f32.vlgmr.msra.gmra.mrb[0].mxu0 %vm109_vm1, %v99_v11  ;;  %s2629_s2 = scalar_lea.vmem %s2020_s29, 256  ;;  %p2634_p13 = scmp.lt.s32.totalorder %s2020_s29, %s2020_s29 }
  0x62   :  { %2357 = vmatpush3.bf16.msra.mxu1 %v2815_v12  ;;  %2180 = vmatprep.mubr.msk.f32.mxu0 %vm2667_vm0, %v2668_v1  ;;  %p2630_p12 = scmp.ne.s32.totalorder %s2020_s29, %s2629_s2  ;;  %p2635_p0 = scmp.lt.s32.totalorder %s2629_s2, %s2629_s2 }
  0x63   :  { %2364 = vmatprep.subr.bf16.mxu1 %v2666_v0  ;;  %2360 = vmatpush3.bf16.msra.mxu0 %v2834_v17 }
  0x64   :  { %2361 = vmatprep.subr.bf16.mxu0 %v2666_v0  ;;  %p2636_p1 = por %p2635_p0, %p2634_p13 }
  0x65   :  { %2170 = vmatmul.mubr.msk.f32.vlgmr.msra.gmra.mrb[0].mxu1 %vm206_vm2, %v2036_v13 }
  0x66   :  { %2366 = vmatpush3.bf16.msra.mxu1 %v2811_v8  ;;  %2191 = vmatprep.mubr.msk.f32.mxu1 %vm2667_vm0, %v2668_v1  ;;  %p2637_p2 = pnand %p2636_p1, %p2630_p12 }
  0x67   :  { %2367 = vmatprep.subr.bf16.mxu1 %v2666_v0  ;;  %2363 = vmatpush3.bf16.msra.mxu0 %v2837_v19 }
  0x68   :  { %2370 = vmatprep.subr.bf16.mxu0 %v2666_v0 }
  0x6a   :  { %2369 = vmatpush3.bf16.msra.mxu1 %v2815_v12 }
  0x6b   :  { %2376 = vmatprep.subr.bf16.mxu1 %v2666_v0 }
 0x134   :  { %v2160_v21 = vpop.f32.mrb[0].mxu0 }
 0x135   :  { %v2845_v22 = vadd.f32 %v2160_v21, %v2033_v20  ;;  %v182_v23 = vpop.f32.mrb[1].mxu0 }
 0x136   :  { %v2847_v24 = vadd.f32 %v2033_v20, %v182_v23  ;;  %v2884_v20 = vsub.s32 0, %v1638_v5 }
 0x138   :  { %v275_v25 = vpop.f32.mrb[0].mxu1 }
 0x139   :  { %v279_v26 = vadd.f32 %v275_v25, %v2847_v24  ;;  %v2171_v27 = vpop.f32.mrb[1].mxu1 }
 0x13b   :  { %v2038_v28 = vmul.f32 -1.442695, %v279_v26 }
 0x13d   :  { %2471 = vpow2.f32 %v2038_v28 }
 0x147   :  { %v2472_v29 = vpop.eup %2471 }
 0x148   :  { %v283_v30 = vadd.f32 1.0, %v2472_v29 }
 0x14a   :  { %2473 = vrcp.f32 %v283_v30 }
 0x154   :  { %v2474_v31 = vpop.eup %2473 }
 0x155   :  { %v286_v32 = vmul.f32 %v2474_v31, %v2036_v13  ;;  %v366_v39 = vsub.f32 1.0, %v2474_v31 }
 0x157   :  { %2181 = vmatmul.mubr.msk.f32.vlgmr.msra.gmra.mrb[2].mxu0 %vm206_vm2, %v286_v32 }
 0x158   :  { %2372 = vmatpush3.bf16.msra.mxu0 %v2834_v17  ;;  %2202 = vmatprep.mubr.msk.f32.mxu0 %vm2667_vm0, %v2668_v1 }
 0x159   :  { %2373 = vmatprep.subr.bf16.mxu0 %v2666_v0 }
 0x15c   :  { %2375 = vmatpush3.bf16.msra.mxu0 %v2837_v19 }
 0x15d   :  { %2382 = vmatprep.subr.bf16.mxu0 %v2666_v0 }
 0x22a   :  { %v356_v33 = vpop.f32.mrb[2].mxu0 }
 0x22b   :  { %361 = vrot.lane.b32.xlu0 %v356_v33, %s2669_s3  ;;  %v2182_v34 = vpop.f32.mrb[3].mxu0 }
 0x22f   :  { %367 = vrot.lane.b32.xlu0 %v2036_v13, %s2670_s23 }
 0x29d   :  { %v362_v35 = vpop.permute.xlu0 %361 }
 0x29e   :  { %v364_v36 = vadd.f32 %v362_v35, %v2847_v24 }
 0x2a0   :  { %2475 = vtanh.f32 %v364_v36 }
 0x2a1   :  { %v368_v38 = vpop.permute.xlu0 %367 }
 0x2a2   :  { %v370_v41 = vmul.f32 %v368_v38, %v366_v39 }
 0x2aa   :  { %v2476_v37 = vpop.eup %2475 }
 0x2ab   :  { %372 = vrot.lane.b32.xlu1 %v2476_v37, %s2671_s24 }
 0x31d   :  { %v373_v40 = vpop.permute.xlu1 %372 }
 0x31e   :  { %v375_v42 = vmul.f32 %v2474_v31, %v373_v40 }
 0x320   :  { %v376_v43 = vadd.f32 %v375_v42, %v370_v41 }
 0x322   :  { %378 = vrot.lane.b32.xlu1 %v376_v43, %s2671_s24  ;;  %v462_v44 = vrot.slane %v376_v43, 6  ;;  %v1640_v14 = vrot.slane %v376_v43, %v2880_v9 }
 0x324   :  { %463 = vrot.lane.b32.xlu0 %v462_v44, %s2671_s24  ;;  %v1641_v25 = vcombine.high %v1640_v14, %v1640_v14  ;;  %v1648_v28 = vrot.slane %v1640_v14, %v2880_v9 }
 0x326   :  { %v1655_v31 = vrot.slane %v1641_v25, %v2880_v9 }
 0x394   :  { %v379_v45 = vpop.permute.xlu1 %378 }
 0x395   :  { %2192 = vmatmul.mubr.msk.f32.vlgmr.msra.gmra.mrb[2].mxu1 %vm206_vm2, %v379_v45 }
 0x396   :  { %2378 = vmatpush3.bf16.msra.mxu1 %v2811_v8  ;;  %2213 = vmatprep.mubr.msk.f32.mxu1 %vm2667_vm0, %v2668_v1  ;;  %v464_v54 = vpop.permute.xlu0 %463 }
 0x397   :  { %2379 = vmatprep.subr.bf16.mxu1 %v2666_v0 }
 0x39a   :  { %2381 = vmatpush3.bf16.msra.mxu1 %v2815_v12 }
 0x39b   :  { %2388 = vmatprep.subr.bf16.mxu1 %v2666_v0 }
 0x468   :  { %v448_v46 = vpop.f32.mrb[2].mxu1 }
 0x469   :  { %v453_v47 = vrot.slane %v448_v46, 6  ;;  %v2193_v48 = vpop.f32.mrb[3].mxu1 }
 0x46b   :  { %v455_v49 = vadd.f32 %v453_v47, %v2847_v24 }
 0x46d   :  { %v2041_v50 = vmul.f32 -1.442695, %v455_v49 }
 0x46f   :  { %2477 = vpow2.f32 %v2041_v50 }
 0x479   :  { %v2478_v51 = vpop.eup %2477 }
 0x47a   :  { %v459_v52 = vadd.f32 1.0, %v2478_v51 }
 0x47c   :  { %2479 = vrcp.f32 %v459_v52 }
 0x486   :  { %v2480_v53 = vpop.eup %2479 }
 0x487   :  { %v466_v55 = vmul.f32 %v2480_v53, %v464_v54  ;;  %v548_v6 = vsub.f32 1.0, %v2480_v53 }
 0x489   :  { %v468_v56 = vrot.slane %v466_v55, 2  ;;  %v550_v10 = vmul.f32 %v548_v6, %v462_v44 }
 0x48b   :  { %2203 = vmatmul.mubr.msk.f32.vlgmr.msra.gmra.mrb[4].mxu0 %vm206_vm2, %v468_v56 }
 0x48c   :  { %2384 = vmatpush3.bf16.msra.mxu0 %v2834_v17  ;;  %2224 = vmatprep.mubr.msk.f32.mxu0 %vm2667_vm0, %v2668_v1 }
 0x48d   :  { %2385 = vmatprep.subr.bf16.mxu0 %v2666_v0 }
 0x490   :  { %2387 = vmatpush3.bf16.msra.mxu0 %v2837_v19 }
 0x491   :  { %2394 = vmatprep.subr.bf16.mxu0 %v2666_v0 }
 0x55e   :  { %v537_v57 = vpop.f32.mrb[4].mxu0 }
 0x55f   :  { %v542_v58 = vrot.slane %v537_v57, 6  ;;  %v2204_v59 = vpop.f32.mrb[5].mxu0 }
 0x561   :  { %543 = vrot.lane.b32.xlu1 %v542_v58, %s2669_s3 }
 0x5d3   :  { %v544_v60 = vpop.permute.xlu1 %543 }
 0x5d4   :  { %v546_v61 = vadd.f32 %v544_v60, %v2847_v24 }
 0x5d6   :  { %2481 = vtanh.f32 %v546_v61 }
 0x5e0   :  { %v2482_v62 = vpop.eup %2481 }
 0x5e1   :  { %552 = vrot.lane.b32.xlu0 %v2482_v62, %s2671_s24 }
 0x653   :  { %v553_v7 = vpop.permute.xlu0 %552 }
 0x654   :  { %v555_v11 = vmul.f32 %v2480_v53, %v553_v7 }
 0x656   :  { %v556_v13 = vadd.f32 %v555_v11, %v550_v10 }
 0x658   :  { %v1664_v15 = vrot.slane %v556_v13, %v2880_v9  ;;  %v643_v16 = vrot.slane %v556_v13, 6  ;;  %v558_v18 = vrot.slane %v556_v13, 2 }
 0x65a   :  { %v1665_v21 = vcombine.high %v1664_v15, %v1664_v15  ;;  %v1672_v23 = vrot.slane %v1664_v15, %v2880_v9  ;;  %644 = vrot.lane.b32.xlu0 %v643_v16, %s2671_s24  ;;  %559 = vrot.lane.b32.xlu1 %v558_v18, %s2671_s24 }
 0x65c   :  { %v1679_v26 = vrot.slane %v1665_v21, %v2880_v9  ;;  %v1680_v27 = vcombine.high %v1672_v23, %v1672_v23 }
 0x65e   :  { %v1681_v29 = vcombine.high %v1679_v26, %v1679_v26  ;;  %v1828_v30 = vrot.slane %v1680_v27, %v2884_v20 }
 0x660   :  { %v1832_v32 = vrot.slane %v1681_v29, %v2884_v20  ;;  %v1896_v33 = vsel %vm1895_vm3, %v1648_v28, %v1828_v30 }
 0x662   :  { %v1897_v34 = vsel %vm1895_vm3, %v1655_v31, %v1832_v32 }
 0x6cc   :  { %v560_v35 = vpop.permute.xlu1 %559  ;;  %v645_v44 = vpop.permute.xlu0 %644 }
 0x6cd   :  { %2214 = vmatmul.mubr.msk.f32.vlgmr.msra.gmra.mrb[4].mxu1 %vm206_vm2, %v560_v35 }
 0x6ce   :  { %2390 = vmatpush3.bf16.msra.mxu1 %v2811_v8  ;;  %2235 = vmatprep.mubr.msk.f32.mxu1 %vm2667_vm0, %v2668_v1 }
 0x6cf   :  { %2391 = vmatprep.subr.bf16.mxu1 %v2666_v0 }
 0x6d2   :  { %2393 = vmatpush3.bf16.msra.mxu1 %v2815_v12 }
 0x6d3   :  { %2400 = vmatprep.subr.bf16.mxu1 %v2666_v0 }
 0x7a0   :  { %v629_v36 = vpop.f32.mrb[4].mxu1 }
 0x7a1   :  { %v634_v37 = vrot.slane %v629_v36, 4  ;;  %v2215_v38 = vpop.f32.mrb[5].mxu1 }
 0x7a3   :  { %v636_v39 = vadd.f32 %v634_v37, %v2847_v24 }
 0x7a5   :  { %v2044_v40 = vmul.f32 -1.442695, %v636_v39 }
 0x7a7   :  { %2483 = vpow2.f32 %v2044_v40 }
 0x7b1   :  { %v2484_v41 = vpop.eup %2483 }
 0x7b2   :  { %v640_v42 = vadd.f32 1.0, %v2484_v41 }
 0x7b4   :  { %2485 = vrcp.f32 %v640_v42 }
 0x7be   :  { %v2486_v43 = vpop.eup %2485 }
 0x7bf   :  { %v647_v45 = vmul.f32 %v2486_v43, %v645_v44  ;;  %v729_v53 = vsub.f32 1.0, %v2486_v43 }
 0x7c1   :  { %v649_v46 = vrot.slane %v647_v45, 4  ;;  %v731_v55 = vmul.f32 %v729_v53, %v643_v16 }
 0x7c3   :  { %2225 = vmatmul.mubr.msk.f32.vlgmr.msra.gmra.mrb[6].mxu0 %vm206_vm2, %v649_v46 }
 0x7c4   :  { %2396 = vmatpush3.bf16.msra.mxu0 %v2834_v17  ;;  %2246 = vmatprep.mubr.msk.f32.mxu0 %vm2667_vm0, %v2668_v1 }
 0x7c5   :  { %2397 = vmatprep.subr.bf16.mxu0 %v2666_v0 }
 0x7c8   :  { %2399 = vmatpush3.bf16.msra.mxu0 %v2837_v19 }
 0x7c9   :  { %2406 = vmatprep.subr.bf16.mxu0 %v2666_v0 }
 0x896   :  { %v718_v47 = vpop.f32.mrb[6].mxu0 }
 0x897   :  { %v723_v48 = vrot.slane %v718_v47, 4  ;;  %v2226_v49 = vpop.f32.mrb[7].mxu0 }
 0x899   :  { %724 = vrot.lane.b32.xlu1 %v723_v48, %s2669_s3 }
 0x90b   :  { %v725_v50 = vpop.permute.xlu1 %724 }
 0x90c   :  { %v727_v51 = vadd.f32 %v725_v50, %v2847_v24 }
 0x90e   :  { %2487 = vtanh.f32 %v727_v51 }
 0x918   :  { %v2488_v52 = vpop.eup %2487 }
 0x919   :  { %733 = vrot.lane.b32.xlu0 %v2488_v52, %s2671_s24 }
 0x98b   :  { %v734_v54 = vpop.permute.xlu0 %733 }
 0x98c   :  { %v736_v56 = vmul.f32 %v2486_v43, %v734_v54 }
 0x98e   :  { %v737_v57 = vadd.f32 %v736_v56, %v731_v55 }
 0x990   :  { %v1682_v58 = vcombine.high %v737_v57, %v737_v57  ;;  %v824_v59 = vrot.slane %v737_v57, 6  ;;  %v739_v60 = vrot.slane %v737_v57, 4 }
 0x992   :  { %v1689_v61 = vrot.slane %v1682_v58, %v2880_v9  ;;  %825 = vrot.lane.b32.xlu0 %v824_v59, %s2671_s24  ;;  %740 = vrot.lane.b32.xlu1 %v739_v60, %s2671_s24 }
 0x994   :  { %v1690_v62 = vcombine.high %v1689_v61, %v1689_v61  ;;  %v1697_v63 = vrot.slane %v1689_v61, %v2880_v9 }
 0x996   :  { %v1704_v2 = vrot.slane %v1690_v62, %v2880_v9  ;;  %v1838_v3 = vrot.slane %v1697_v63, %v2884_v20 }
 0x998   :  { %v1842_v4 = vrot.slane %v1704_v2, %v2884_v20  ;;  %v1899_v5 = vsel %vm1898_vm4, %v1896_v33, %v1838_v3 }
 0x99a   :  { %v1900_v6 = vsel %vm1898_vm4, %v1897_v34, %v1842_v4 }
 0xa04   :  { %v741_v7 = vpop.permute.xlu1 %740  ;;  %v826_v23 = vpop.permute.xlu0 %825 }
 0xa05   :  { %2236 = vmatmul.mubr.msk.f32.vlgmr.msra.gmra.mrb[6].mxu1 %vm206_vm2, %v741_v7 }
 0xa06   :  { %2402 = vmatpush3.bf16.msra.mxu1 %v2811_v8  ;;  %2257 = vmatprep.mubr.msk.f32.mxu1 %vm2667_vm0, %v2668_v1 }
 0xa07   :  { %2403 = vmatprep.subr.bf16.mxu1 %v2666_v0 }
 0xa0a   :  { %2405 = vmatpush3.bf16.msra.mxu1 %v2815_v12 }
 0xa0b   :  { %2412 = vmatprep.subr.bf16.mxu1 %v2666_v0 }
 0xad8   :  { %v810_v10 = vpop.f32.mrb[6].mxu1 }
 0xad9   :  { %v815_v11 = vrot.slane %v810_v10, 2  ;;  %v2237_v13 = vpop.f32.mrb[7].mxu1 }
 0xadb   :  { %v817_v14 = vadd.f32 %v815_v11, %v2847_v24 }
 0xadd   :  { %v2047_v15 = vmul.f32 -1.442695, %v817_v14 }
 0xadf   :  { %2489 = vpow2.f32 %v2047_v15 }
 0xae9   :  { %v2490_v16 = vpop.eup %2489 }
 0xaea   :  { %v821_v18 = vadd.f32 1.0, %v2490_v16 }
 0xaec   :  { %2491 = vrcp.f32 %v821_v18 }
 0xaf6   :  { %v2492_v21 = vpop.eup %2491 }
 0xaf7   :  { %v828_v25 = vmul.f32 %v2492_v21, %v826_v23  ;;  %v910_v33 = vsub.f32 1.0, %v2492_v21 }
 0xaf9   :  { %v830_v26 = vrot.slane %v828_v25, 6  ;;  %v912_v35 = vmul.f32 %v910_v33, %v824_v59 }
 0xafb   :  { %2247 = vmatmul.mubr.msk.f32.vlgmr.msra.gmra.mrb[8].mxu0 %vm206_vm2, %v830_v26 }
 0xafc   :  { %2408 = vmatpush3.bf16.msra.mxu0 %v2834_v17  ;;  %2268 = vmatprep.mubr.msk.f32.mxu0 %vm2667_vm0, %v2668_v1 }
 0xafd   :  { %2409 = vmatprep.subr.bf16.mxu0 %v2666_v0 }
 0xb00   :  { %2411 = vmatpush3.bf16.msra.mxu0 %v2837_v19 }
 0xb01   :  { %2418 = vmatprep.subr.bf16.mxu0 %v2666_v0 }
 0xbce   :  { %v899_v27 = vpop.f32.mrb[8].mxu0 }
 0xbcf   :  { %v904_v28 = vrot.slane %v899_v27, 2  ;;  %v2248_v29 = vpop.f32.mrb[9].mxu0 }
 0xbd1   :  { %905 = vrot.lane.b32.xlu1 %v904_v28, %s2669_s3 }
 0xc43   :  { %v906_v30 = vpop.permute.xlu1 %905 }
 0xc44   :  { %v908_v31 = vadd.f32 %v906_v30, %v2847_v24 }
 0xc46   :  { %2493 = vtanh.f32 %v908_v31 }
 0xc50   :  { %v2494_v32 = vpop.eup %2493 }
 0xc51   :  { %914 = vrot.lane.b32.xlu0 %v2494_v32, %s2671_s24 }
 0xcc3   :  { %v915_v34 = vpop.permute.xlu0 %914 }
 0xcc4   :  { %v917_v36 = vmul.f32 %v2492_v21, %v915_v34 }
 0xcc6   :  { %v918_v37 = vadd.f32 %v917_v36, %v912_v35 }
 0xcc8   :  { %v1705_v38 = vcombine.high %v918_v37, %v918_v37  ;;  %v920_v39 = vrot.slane %v918_v37, 6 }
 0xcca   :  { %v1712_v40 = vrot.slane %v1705_v38, %v2880_v9  ;;  %921 = vrot.lane.b32.xlu1 %v920_v39, %s2671_s24 }
 0xccc   :  { %v1713_v41 = vcombine.high %v1712_v40, %v1712_v40  ;;  %v1720_v42 = vrot.slane %v1712_v40, %v2880_v9 }
 0xcce   :  { %v1727_v24 = vrot.slane %v1713_v41, %v2880_v9  ;;  %v1728_v43 = vcombine.high %v1720_v42, %v1720_v42 }
 0xcd0   :  { %v1729_v44 = vcombine.high %v1727_v24, %v1727_v24  ;;  %v1848_v45 = vrot.slane %v1728_v43, %v2884_v20 }
 0xcd2   :  { %v1852_v46 = vrot.slane %v1729_v44, %v2884_v20  ;;  %v1902_v47 = vsel %vm1901_vm5, %v1899_v5, %v1848_v45 }
 0xcd4   :  { %v1903_v48 = vsel %vm1901_vm5, %v1900_v6, %v1852_v46 }
 0xd3c   :  { %v922_v49 = vpop.permute.xlu1 %921 }
 0xd3d   :  { %2258 = vmatmul.mubr.msk.f32.vlgmr.msra.gmra.mrb[8].mxu1 %vm206_vm2, %v922_v49 }
 0xd3e   :  { %2414 = vmatpush3.bf16.msra.mxu1 %v2811_v8  ;;  %2279 = vmatprep.mubr.msk.f32.mxu1 %vm2667_vm0, %v2668_v1 }
 0xd3f   :  { %2415 = vmatprep.subr.bf16.mxu1 %v2666_v0 }
 0xd42   :  { %2417 = vmatpush3.bf16.msra.mxu1 %v2815_v12 }
 0xd43   :  { %2424 = vmatprep.subr.bf16.mxu1 %v2666_v0 }
 0xe10   :  { %v991_v50 = vpop.f32.mrb[8].mxu1 }
 0xe11   :  { %v995_v51 = vadd.f32 %v991_v50, %v2845_v22  ;;  %v2259_v52 = vpop.f32.mrb[9].mxu1 }
 0xe13   :  { %v2050_v53 = vmul.f32 -1.442695, %v995_v51 }
 0xe15   :  { %2495 = vpow2.f32 %v2050_v53 }
 0xe1f   :  { %v2496_v54 = vpop.eup %2495 }
 0xe20   :  { %v999_v55 = vadd.f32 1.0, %v2496_v54 }
 0xe22   :  { %2497 = vrcp.f32 %v999_v55 }
 0xe2c   :  { %v2498_v56 = vpop.eup %2497 }
 0xe2d   :  { %v1003_v57 = vmul.f32 %v2498_v56, %v922_v49  ;;  %v1083_v63 = vsub.f32 1.0, %v2498_v56 }
 0xe2f   :  { %2269 = vmatmul.mubr.msk.f32.vlgmr.msra.gmra.mrb[10].mxu0 %vm206_vm2, %v1003_v57  ;;  %v1085_v3 = vmul.f32 %v1083_v63, %v920_v39 }
 0xe30   :  { %2420 = vmatpush3.bf16.msra.mxu0 %v2834_v17  ;;  %2290 = vmatprep.mubr.msk.f32.mxu0 %vm2667_vm0, %v2668_v1 }
 0xe31   :  { %2421 = vmatprep.subr.bf16.mxu0 %v2666_v0 }
 0xe34   :  { %2423 = vmatpush3.bf16.msra.mxu0 %v2837_v19 }
 0xe35   :  { %2430 = vmatprep.subr.bf16.mxu0 %v2666_v0 }
 0xf02   :  { %v1073_v58 = vpop.f32.mrb[10].mxu0 }
 0xf03   :  { %1078 = vrot.lane.b32.xlu0 %v1073_v58, %s2669_s3  ;;  %v2270_v59 = vpop.f32.mrb[11].mxu0 }
 0xf75   :  { %v1079_v60 = vpop.permute.xlu0 %1078 }
 0xf76   :  { %v1081_v61 = vadd.f32 %v1079_v60, %v2845_v22 }
 0xf78   :  { %2499 = vtanh.f32 %v1081_v61 }
 0xf82   :  { %v2500_v62 = vpop.eup %2499 }
 0xf83   :  { %1087 = vrot.lane.b32.xlu1 %v2500_v62, %s2671_s24 }
 0xff5   :  { %v1088_v2 = vpop.permute.xlu1 %1087 }
 0xff6   :  { %v1090_v4 = vmul.f32 %v2498_v56, %v1088_v2 }
 0xff8   :  { %v1091_v5 = vadd.f32 %v1090_v4, %v1085_v3 }
 0xffa   :  { %v1736_v6 = vrot.slane %v1091_v5, %v2880_v9  ;;  %1093 = vrot.lane.b32.xlu0 %v1091_v5, %s2671_s24  ;;  %v1177_v7 = vrot.slane %v1091_v5, 6 }
 0xffc   :  { %v1737_v10 = vcombine.high %v1736_v6, %v1736_v6  ;;  %v1744_v11 = vrot.slane %v1736_v6, %v2880_v9  ;;  %1178 = vrot.lane.b32.xlu1 %v1177_v7, %s2671_s24 }
 0xffe   :  { %v1751_v13 = vrot.slane %v1737_v10, %v2880_v9  ;;  %v1858_v14 = vrot.slane %v1744_v11, %v2884_v20 }
0x1000   :  { %v1905_v15 = vsel %vm1904_vm6, %v1902_v47, %v1858_v14  ;;  %v1862_v16 = vrot.slane %v1751_v13, %v2884_v20 }
0x1002   :  { %v1906_v18 = vsel %vm1904_vm6, %v1903_v48, %v1862_v16 }
0x106c   :  { %v1094_v21 = vpop.permute.xlu0 %1093 }
0x106d   :  { %2280 = vmatmul.mubr.msk.f32.vlgmr.msra.gmra.mrb[10].mxu1 %vm206_vm2, %v1094_v21 }
0x106e   :  { %2426 = vmatpush3.bf16.msra.mxu1 %v2811_v8  ;;  %2301 = vmatprep.mubr.msk.f32.mxu1 %vm2667_vm0, %v2668_v1  ;;  %v1179_v32 = vpop.permute.xlu1 %1178 }
0x106f   :  { %2427 = vmatprep.subr.bf16.mxu1 %v2666_v0 }
0x1072   :  { %2429 = vmatpush3.bf16.msra.mxu1 %v2815_v12 }
0x1073   :  { %2436 = vmatprep.subr.bf16.mxu1 %v2666_v0 }
0x1140   :  { %v1163_v23 = vpop.f32.mrb[10].mxu1 }
0x1141   :  { %v1168_v25 = vrot.slane %v1163_v23, 6  ;;  %v2281_v26 = vpop.f32.mrb[11].mxu1 }
0x1143   :  { %v1170_v27 = vadd.f32 %v1168_v25, %v2845_v22 }
0x1145   :  { %v2053_v28 = vmul.f32 -1.442695, %v1170_v27 }
0x1147   :  { %2501 = vpow2.f32 %v2053_v28 }
0x1151   :  { %v2502_v29 = vpop.eup %2501 }
0x1152   :  { %v1174_v30 = vadd.f32 1.0, %v2502_v29 }
0x1154   :  { %2503 = vrcp.f32 %v1174_v30 }
0x115e   :  { %v2504_v31 = vpop.eup %2503 }
0x115f   :  { %v1181_v33 = vmul.f32 %v2504_v31, %v1179_v32  ;;  %v1263_v41 = vsub.f32 1.0, %v2504_v31 }
0x1161   :  { %v1183_v34 = vrot.slane %v1181_v33, 2  ;;  %v1265_v24 = vmul.f32 %v1263_v41, %v1177_v7 }
0x1163   :  { %2291 = vmatmul.mubr.msk.f32.vlgmr.msra.gmra.mrb[12].mxu0 %vm206_vm2, %v1183_v34 }
0x1164   :  { %2432 = vmatpush3.bf16.msra.mxu0 %v2834_v17  ;;  %2312 = vmatprep.mubr.msk.f32.mxu0 %vm2667_vm0, %v2668_v1 }
0x1165   :  { %2433 = vmatprep.subr.bf16.mxu0 %v2666_v0 }
0x1168   :  { %2435 = vmatpush3.bf16.msra.mxu0 %v2837_v19 }
0x1169   :  { %2442 = vmatprep.subr.bf16.mxu0 %v2666_v0 }
0x1236   :  { %v1252_v35 = vpop.f32.mrb[12].mxu0 }
0x1237   :  { %v1257_v36 = vrot.slane %v1252_v35, 6  ;;  %v2292_v37 = vpop.f32.mrb[13].mxu0 }
0x1239   :  { %1258 = vrot.lane.b32.xlu0 %v1257_v36, %s2669_s3 }
0x12ab   :  { %v1259_v38 = vpop.permute.xlu0 %1258 }
0x12ac   :  { %v1261_v39 = vadd.f32 %v1259_v38, %v2845_v22 }
0x12ae   :  { %2505 = vtanh.f32 %v1261_v39 }
0x12b8   :  { %v2506_v40 = vpop.eup %2505 }
0x12b9   :  { %1267 = vrot.lane.b32.xlu1 %v2506_v40, %s2671_s24 }
0x132b   :  { %v1268_v42 = vpop.permute.xlu1 %1267 }
0x132c   :  { %v1270_v43 = vmul.f32 %v2504_v31, %v1268_v42 }
0x132e   :  { %v1271_v44 = vadd.f32 %v1270_v43, %v1265_v24 }
0x1330   :  { %v1758_v45 = vrot.slane %v1271_v44, %v2880_v9  ;;  %v1358_v46 = vrot.slane %v1271_v44, 6  ;;  %v1273_v47 = vrot.slane %v1271_v44, 2 }
0x1332   :  { %v1759_v48 = vcombine.high %v1758_v45, %v1758_v45  ;;  %v1766_v49 = vrot.slane %v1758_v45, %v2880_v9  ;;  %1359 = vrot.lane.b32.xlu1 %v1358_v46, %s2671_s24  ;;  %1274 = vrot.lane.b32.xlu0 %v1273_v47, %s2671_s24 }
0x1334   :  { %v1773_v50 = vrot.slane %v1759_v48, %v2880_v9  ;;  %v1774_v51 = vcombine.high %v1766_v49, %v1766_v49  ;;  %v1916_v48 = vld [vmem:[#allocation10] sm:$0xff]  ;;  %v1917_v49 = vld [vmem:[#allocation10 + $0x8] sm:$0xff] }
0x1336   :  { %v1775_v52 = vcombine.high %v1773_v50, %v1773_v50  ;;  %v1868_v53 = vrot.slane %v1774_v51, %v2884_v20  ;;  %v1918_v50 = vld [vmem:[#allocation10 + $0x10] sm:$0xff]  ;;  %v2448_v51 = vpack.c.bf16 %v1917_v49, %v1916_v48 }
0x1338   :  { %v1908_v54 = vsel %vm1907_vm7, %v1905_v15, %v1868_v53  ;;  %v1872_v55 = vrot.slane %v1775_v52, %v2884_v20  ;;  %v1919_v52 = vld [vmem:[#allocation10 + $0x18] sm:$0xff] }
0x1339   :  { %v2452_v53 = vpack.c.bf16 %v1919_v52, %v1918_v50 }
0x133a   :  { %v1909_v56 = vsel %vm1907_vm7, %v1906_v18, %v1872_v55 }
0x13a4   :  { %v1275_v57 = vpop.permute.xlu0 %1274  ;;  %v1360_v4 = vpop.permute.xlu1 %1359 }
0x13a5   :  { %2302 = vmatmul.mubr.msk.f32.vlgmr.msra.gmra.mrb[12].mxu1 %vm206_vm2, %v1275_v57 }
0x13a6   :  { %2438 = vmatpush3.bf16.msra.mxu1 %v2811_v8  ;;  %2323 = vmatprep.mubr.msk.f32.mxu1 %vm2667_vm0, %v2668_v1 }
0x13a7   :  { %2439 = vmatprep.subr.bf16.mxu1 %v2666_v0 }
0x13aa   :  { %2441 = vmatpush3.bf16.msra.mxu1 %v2815_v12 }
0x13ab   :  { %2449 = vmatprep.subr.bf16.mxu1 %v2448_v51 }
0x1478   :  { %v1344_v58 = vpop.f32.mrb[12].mxu1 }
0x1479   :  { %v1349_v59 = vrot.slane %v1344_v58, 4  ;;  %v2303_v60 = vpop.f32.mrb[13].mxu1 }
0x147b   :  { %v1351_v61 = vadd.f32 %v1349_v59, %v2845_v22 }
0x147d   :  { %v2056_v62 = vmul.f32 -1.442695, %v1351_v61 }
0x147f   :  { %2507 = vpow2.f32 %v2056_v62 }
0x1489   :  { %v2508_v63 = vpop.eup %2507 }
0x148a   :  { %v1355_v2 = vadd.f32 1.0, %v2508_v63 }
0x148c   :  { %2509 = vrcp.f32 %v1355_v2 }
0x1496   :  { %v2510_v3 = vpop.eup %2509 }
0x1497   :  { %v1362_v8 = vmul.f32 %v2510_v3, %v1360_v4 }
0x1499   :  { %v1364_v5 = vrot.slane %v1362_v8, 4 }
0x149b   :  { %2313 = vmatmul.mubr.msk.f32.vlgmr.msra.gmra.mrb[14].mxu0 %vm206_vm2, %v1364_v5 }
0x149c   :  { %2444 = vmatpush3.bf16.msra.mxu0 %v2834_v17  ;;  %2334 = vmatprep.mubr.msk.f32.mxu0 %vm2667_vm0, %v2668_v1  ;;  %v1444_v17 = vsub.f32 1.0, %v2510_v3 }
0x149d   :  { %2445 = vmatprep.subr.bf16.mxu0 %v2666_v0 }
0x149e   :  { %v1446_v15 = vmul.f32 %v1444_v17, %v1358_v46 }
0x14a0   :  { %2447 = vmatpush3.bf16.msra.mxu0 %v2837_v19 }
0x156e   :  { %v1433_v12 = vpop.f32.mrb[14].mxu0 }
0x156f   :  { %v1438_v6 = vrot.slane %v1433_v12, 4  ;;  %v2314_v7 = vpop.f32.mrb[15].mxu0 }
0x1571   :  { %1439 = vrot.lane.b32.xlu0 %v1438_v6, %s2669_s3 }
0x15e3   :  { %v1440_v10 = vpop.permute.xlu0 %1439 }
0x15e4   :  { %v1442_v11 = vadd.f32 %v1440_v10, %v2845_v22 }
0x15e6   :  { %2511 = vtanh.f32 %v1442_v11 }
0x15f0   :  { %v2512_v13 = vpop.eup %2511 }
0x15f1   :  { %1448 = vrot.lane.b32.xlu1 %v2512_v13, %s2671_s24 }
0x1663   :  { %v1449_v14 = vpop.permute.xlu1 %1448 }
0x1664   :  { %v1451_v1 = vmul.f32 %v2510_v3, %v1449_v14 }
0x1666   :  { %v1452_v16 = vadd.f32 %v1451_v1, %v1446_v15 }
0x1668   :  { %v1776_v0 = vcombine.high %v1452_v16, %v1452_v16  ;;  %v1539_v18 = vrot.slane %v1452_v16, 6  ;;  %v1454_v19 = vrot.slane %v1452_v16, 4 }
0x166a   :  { %v1783_v21 = vrot.slane %v1776_v0, %v2880_v9  ;;  %1540 = vrot.lane.b32.xlu1 %v1539_v18, %s2671_s24  ;;  %1455 = vrot.lane.b32.xlu0 %v1454_v19, %s2671_s24 }
0x166c   :  { %v1784_v23 = vcombine.high %v1783_v21, %v1783_v21  ;;  %v1791_v25 = vrot.slane %v1783_v21, %v2880_v9 }
0x166e   :  { %v1878_v26 = vrot.slane %v1791_v25, %v2884_v20  ;;  %v1798_v27 = vrot.slane %v1784_v23, %v2880_v9 }
0x1670   :  { %v1911_v28 = vsel %vm1910_vm8, %v1908_v54, %v1878_v26  ;;  %v1882_v29 = vrot.slane %v1798_v27, %v2884_v20 }
0x1672   :  { %v1912_v30 = vsel %vm1910_vm8, %v1909_v56, %v1882_v29 }
0x16dc   :  { %v1456_v31 = vpop.permute.xlu0 %1455  ;;  %v1541_v40 = vpop.permute.xlu1 %1540 }
0x16dd   :  { %2324 = vmatmul.mubr.msk.f32.vlgmr.msra.gmra.mrb[14].mxu1 %vm206_vm2, %v1456_v31 }
0x16de   :  { %2451 = vmatpush3.bf16.msra.mxu1 %v2448_v51 }
0x16df   :  { %2453 = vmatprep.subr.bf16.mxu1 %v2452_v53 }
0x16e2   :  { %2455 = vmatpush3.bf16.msra.mxu1 %v2452_v53 }
0x17b0   :  { %v1525_v32 = vpop.f32.mrb[14].mxu1 }
0x17b1   :  { %v1530_v33 = vrot.slane %v1525_v32, 2  ;;  %v2325_v34 = vpop.f32.mrb[15].mxu1 }
0x17b3   :  { %v1532_v35 = vadd.f32 %v1530_v33, %v2845_v22 }
0x17b5   :  { %v2059_v36 = vmul.f32 -1.442695, %v1532_v35 }
0x17b7   :  { %2513 = vpow2.f32 %v2059_v36 }
0x17c1   :  { %v2514_v37 = vpop.eup %2513 }
0x17c2   :  { %v1536_v38 = vadd.f32 1.0, %v2514_v37 }
0x17c4   :  { %2515 = vrcp.f32 %v1536_v38 }
0x17ce   :  { %v2516_v39 = vpop.eup %2515 }
0x17cf   :  { %v1543_v41 = vmul.f32 %v2516_v39, %v1541_v40  ;;  %v1625_v54 = vsub.f32 1.0, %v2516_v39 }
0x17d1   :  { %v1545_v42 = vrot.slane %v1543_v41, 6  ;;  %v1627_v56 = vmul.f32 %v1625_v54, %v1539_v18 }
0x17d3   :  { %2335 = vmatmul.mubr.msk.f32.vlgmr.msra.gmra.mrb[16].mxu0 %vm206_vm2, %v1545_v42 }
0x18a6   :  { %v1614_v24 = vpop.f32.mrb[16].mxu0 }
0x18a7   :  { %v1619_v43 = vrot.slane %v1614_v24, 2  ;;  %v2336_v44 = vpop.f32.mrb[17].mxu0 }
0x18a9   :  { %1620 = vrot.lane.b32.xlu0 %v1619_v43, %s2669_s3 }
0x191b   :  { %v1621_v45 = vpop.permute.xlu0 %1620 }
0x191c   :  { %v1623_v46 = vadd.f32 %v1621_v45, %v2845_v22 }
0x191e   :  { %2517 = vtanh.f32 %v1623_v46 }
0x1928   :  { %v2518_v47 = vpop.eup %2517 }
0x1929   :  { %1629 = vrot.lane.b32.xlu1 %v2518_v47, %s2671_s24 }
0x199b   :  { %v1630_v55 = vpop.permute.xlu1 %1629 }
0x199c   :  { %v1632_v57 = vmul.f32 %v2516_v39, %v1630_v55 }
0x199e   :  { %v1633_v58 = vadd.f32 %v1632_v57, %v1627_v56 }
0x19a0   :  { %v1800_v22 = vcombine.high %v1633_v58, %v1633_v58 }
0x19a2   :  { %v1807_v59 = vrot.slane %v1800_v22, %v2880_v9 }
0x19a4   :  { %v1808_v60 = vcombine.high %v1807_v59, %v1807_v59  ;;  %v1815_v61 = vrot.slane %v1807_v59, %v2880_v9 }
0x19a6   :  { %v1823_v62 = vcombine.high %v1815_v61, %v1815_v61  ;;  %v1822_v63 = vrot.slane %v1808_v60, %v2880_v9  ;;  %v2061_v9 = vld [vmem:[%s3056_s7] ss:$0 sm:$0xff] }
0x19a8   :  { %v1888_v2 = vrot.slane %v1823_v62, %v2884_v20  ;;  %v1824_v3 = vcombine.high %v1822_v63, %v1822_v63 }
0x19aa   :  { %v1914_v4 = vsel %vm1913_vm9, %v1911_v28, %v1888_v2  ;;  %v1892_v8 = vrot.slane %v1824_v3, %v2884_v20 }
0x19ab   :  { %1929 = vrot.lane.b32.xlu0 %v1914_v4, %s2671_s24 }
0x19ac   :  { %v1915_v5 = vsel %vm1913_vm9, %v1912_v30, %v1892_v8 }
0x19ad   :  { %1931 = vrot.lane.b32.xlu1 %v1915_v5, %s2671_s24 }
0x1a1d   :  { %v1930_v12 = vpop.permute.xlu0 %1929 }
0x1a1e   :  { %2345 = vmatprep.mubr.msk.f32.mxu1 %vm206_vm2, %v1930_v12 }
0x1a1f   :  { %v1932_v6 = vpop.permute.xlu1 %1931 }
0x1a20   :  { %2346 = vmatmul.mubr.msk.f32.vlgmr.msra.gmra.mrb[16].mxu1 %vm206_vm2, %v1932_v6 }
0x1af3   :  { %v2347_v7 = vpop.f32.mrb[16].mxu1 }
0x1af4   :  { %v2009_v10 = vadd.f32 %v2347_v7, %v2061_v9  ;;  %v2003_v20 = vpop.f32.mrb[17].mxu1 }
0x1af5   :  { %v2004_v11 = vadd.f32 %v2061_v9, %v2003_v20 }
0x1af6   :  { %2013 = vst [vmem:[#allocation11 + $0x8] sm:$0xff] %v2009_v10 }
0x1af7   :  { %2012 = vst [vmem:[#allocation11] sm:$0xff] %v2004_v11 }
0x1af8   :  { %2640 = shalt.err (!%p2637_p2)
}
0x1af9   :  { %s2641_s7 = scalar_lea.hbm %s3057_s8, 256 }
0x1afa   :  { %p2642_p3 = scmp.ne.s32.totalorder %s3057_s8, %s2641_s7  ;;  %p2645_p4 = scmp.lt.u32.totalorder %s2641_s7, %s3057_s8 }
0x1afc   :  { %p2647_p5 = pnand %p2645_p4, %p2642_p3 }
0x1afe   :  { %2650 = shalt.err (!%p2647_p5)
}
0x1aff   :  { %2025 = dma.vmem_to_hbm [thread:$0]  %s2020_s29, 256, %s3057_s8, [#allocation4], %s2661_s17, %s2661_s17, %s2662_s18  }
0x1b00   :  { %2657 = dma.done.wait [#allocation4], 256  }
0x1b01   :  { %2658 = vsyncadd [#allocation4], 4294967040 }
0x1b02   :  { %2029 = vsyncpa [#allocation3], 1 }
0x1b03   :  { %2030 = vsyncpa [#allocation6], 1 }
0x1b04   :  { %2031 = vsyncpa [#allocation9], 1 }
0x1b05   :  { %2032 = vsyncpa [#allocation4], 1 }

</bundles_post_ra>
